<compile_context>
chip_gen: v5e
topology: v5e:2x2
jax: 0.10.0
libtpu: 0.0.40
codegen_flags: <defaults>
</compile_context>

<pallas_src>
import functools
import math

import jax
import jax.numpy as jnp
from jax import lax
from jax.experimental import pallas as pl
from jax.experimental.pallas import tpu as pltpu

NEG_INF = -1e30  # finite large-negative constant (avoids -inf - -inf NaNs)


# ---------------------------------------------------------------------------
# Kernel 1: fused, head-grouped QKV projection + RoPE.
# ---------------------------------------------------------------------------
def _qkv_rope_kernel(x_ref, w_ref, b_ref, cos_ref, sa_ref, sb_ref,
                     q_ref, k_ref, v_ref, *, group, head_dim):
    x = x_ref[0]                                          # (ts, H)  bf16
    y = jnp.dot(x, w_ref[0], preferred_element_type=jnp.float32) + b_ref[0]

    gd = group * head_dim
    half = head_dim // 2
    q = y[:, 0 * gd:1 * gd]                               # (ts, g*DH) f32
    k = y[:, 1 * gd:2 * gd]
    v = y[:, 2 * gd:3 * gd]

    cos = cos_ref[...]                                    # (ts, g*DH) f32
    sa = sa_ref[...]                                      # -sin on first halves
    sb = sb_ref[...]                                      # +sin on second halves

    if head_dim % 128 == 0:
        # rotate_half via two XLU rolls (signs folded into sa/sb in the wrapper).
        def rope(t):
            return (t * cos
                    + pltpu.roll(t, shift=gd - half, axis=-1) * sa
                    + pltpu.roll(t, shift=half, axis=-1) * sb)
    else:
        # Small-head fallback (e.g. unit-test shapes): per-head slice/concat.
        sf = sa + sb                                      # sign-folded sin
        def _rot(t):
            parts = []
            for i in range(group):
                th = t[:, i * head_dim:(i + 1) * head_dim]
                parts.append(jnp.concatenate([th[:, half:], th[:, :half]], -1))
            return jnp.concatenate(parts, axis=-1)

        def rope(t):
            return t * cos + _rot(t) * sf

    qr = rope(q)
    kr = rope(k)
    for i in range(group):                                # unrolled at trace time
        sl = slice(i * head_dim, (i + 1) * head_dim)
        q_ref[0, i] = qr[:, sl].astype(q_ref.dtype)
        k_ref[0, i] = kr[:, sl].astype(k_ref.dtype)
        v_ref[0, i] = v[:, sl].astype(v_ref.dtype)


# ---------------------------------------------------------------------------
# Kernel 2: flash-style causal attention (online softmax, in-kernel mask).
# ---------------------------------------------------------------------------
def _flash_kernel(q_ref, k_ref, v_ref, o_ref, m_sc, l_sc, acc_sc,
                  *, block_q, block_kv):
    qi = pl.program_id(1)
    ki = pl.program_id(2)
    nk = pl.num_programs(2)

    @pl.when(ki == 0)
    def _init():
        m_sc[...] = jnp.full_like(m_sc, NEG_INF)
        l_sc[...] = jnp.zeros_like(l_sc)
        acc_sc[...] = jnp.zeros_like(acc_sc)

    q_start = qi * block_q
    k_start = ki * block_kv

    # Skip KV blocks that lie entirely above the causal diagonal (their K/V
    # DMA is also suppressed via the clamped index_map in the wrapper).
    @pl.when(k_start <= q_start + block_q - 1)
    def _update():
        q = q_ref[0]              # (tq, DH) bf16 (pre-scaled by 1/sqrt(DH))
        k = k_ref[0]              # (tk, DH) bf16
        v = v_ref[0]              # (tk, DH) bf16

        # TODO(synk): if MLIR shows a per-step K relayout here, emit K
        #             pre-transposed (G, DH, S) from the QKV kernel instead.
        s = lax.dot_general(q, k, (((1,), (1,)), ((), ())),
                            preferred_element_type=jnp.float32)   # (tq, tk)

        row = q_start + lax.broadcasted_iota(jnp.int32, (block_q, block_kv), 0)
        col = k_start + lax.broadcasted_iota(jnp.int32, (block_q, block_kv), 1)
        s = jnp.where(row >= col, s, NEG_INF)

        m_prev = m_sc[...]
        m_new = jnp.maximum(m_prev, s.max(axis=-1, keepdims=True))
        alpha = jnp.exp(m_prev - m_new)
        p = jnp.exp(s - m_new)
        l_sc[...] = alpha * l_sc[...] + p.sum(axis=-1, keepdims=True)
        acc_sc[...] = alpha * acc_sc[...] + jnp.dot(
            p.astype(v.dtype), v, preferred_element_type=jnp.float32)
        m_sc[...] = m_new

    @pl.when(ki == nk - 1)
    def _finalize():
        inv_l = pl.reciprocal(l_sc[...], approx=True)
        o_ref[0] = (acc_sc[...] * inv_l).astype(o_ref.dtype)


# ---------------------------------------------------------------------------
# Kernel 3: output projection — single K=H matmul with W_o resident in VMEM.
# ---------------------------------------------------------------------------
def _oproj_kernel(ctx_ref, wo_ref, bo_ref, o_ref, *, num_heads):
    # ctx_ref: (1, NH, tm, DH) bf16 ; wo_ref: (H, H) bf16 ; bo_ref: (1, H) f32
    parts = [ctx_ref[0, h] for h in range(num_heads)]     # each (tm, DH)
    x = jnp.concatenate(parts, axis=-1)                   # (tm, H) bf16
    acc = jnp.dot(x, wo_ref[...], preferred_element_type=jnp.float32)
    o_ref[0] = (acc + bo_ref[...]).astype(o_ref.dtype)


# ---------------------------------------------------------------------------
# Wrapper
# ---------------------------------------------------------------------------
def internlm_attention(hidden_states, params, cos, sin, *,
                       head_group=None, block_s=None, block_q=None,
                       block_kv=None, block_m=None,
                       vmem_limit_bytes=64 * 1024 * 1024):
    """hidden_states: (B, S, H). Causal attention, position_ids = arange(S)."""
    B, S, H = hidden_states.shape
    NH = int(params["num_heads"])
    DH = H // NH
    assert NH * DH == H

    def _pick(b, default=256):
        b = min(S, default) if b is None else b
        assert S % b == 0, (S, b)
        return b

    block_s, block_q = _pick(block_s), _pick(block_q)
    block_kv, block_m = _pick(block_kv), _pick(block_m)

    if head_group is None:
        # g=4 keeps the double-buffered fused weight block within v7x's 64 MiB.
        head_group = next(d for d in (4, 2, 1) if NH % d == 0)
    g = head_group
    assert NH % g == 0
    NG = NH // g
    gd = g * DH
    half = DH // 2
    scale = 1.0 / math.sqrt(DH)

    x = hidden_states.astype(jnp.bfloat16)
    cos = cos.astype(jnp.float32)                         # (S, DH)
    sin = sin.astype(jnp.float32)

    # ---- fused, head-grouped QKV weights / biases (Q scale folded in f32) --
    def group_w(w, s=1.0):
        w = (w.astype(jnp.float32) * s).reshape(H, NG, g, DH)
        return w.transpose(1, 0, 2, 3).reshape(NG, H, gd)

    def group_b(b, s=1.0):
        return (b.astype(jnp.float32) * s).reshape(NG, 1, gd)

    wqkv = jnp.concatenate(
        [group_w(params["wq"], scale), group_w(params["wk"]),
         group_w(params["wv"])], axis=-1).astype(jnp.bfloat16)   # (NG, H, 3*gd)
    bqkv = jnp.concatenate(
        [group_b(params["bq"], scale), group_b(params["bk"]),
         group_b(params["bv"])], axis=-1)                        # (NG, 1, 3*gd)

    # RoPE tables tiled to the group width with rotate_half signs folded in:
    # sa is -sin on each head's first half (0 elsewhere), sb is +sin on the
    # second half (0 elsewhere).
    z1 = jnp.zeros_like(sin[:, :half])
    z2 = jnp.zeros_like(sin[:, half:])
    sin_a = jnp.concatenate([-sin[:, :half], z2], axis=-1)
    sin_b = jnp.concatenate([z1, sin[:, half:]], axis=-1)
    cos_g = jnp.tile(cos, (1, g))
    sa_g = jnp.tile(sin_a, (1, g))
    sb_g = jnp.tile(sin_b, (1, g))

    wo = params["wo"].astype(jnp.bfloat16)                # (H, H)
    bo = params["bo"].astype(jnp.float32).reshape(1, H)

    def cparams(sem):
        return pltpu.CompilerParams(dimension_semantics=sem,
                                    vmem_limit_bytes=vmem_limit_bytes)

    # ---- 1) fused head-grouped QKV projection + RoPE ------------------------
    ns = S // block_s
    head_out = pl.BlockSpec((1, g, block_s, DH), lambda gi, b, si: (b, gi, si, 0))
    qkv_shape = jax.ShapeDtypeStruct((B, NH, S, DH), jnp.bfloat16)
    q4, k4, v4 = pl.pallas_call(
        functools.partial(_qkv_rope_kernel, group=g, head_dim=DH),
        out_shape=(qkv_shape, qkv_shape, qkv_shape),
        grid_spec=pltpu.PrefetchScalarGridSpec(
            num_scalar_prefetch=0,
            grid=(NG, B, ns),
            in_specs=[
                pl.BlockSpec((1, block_s, H), lambda gi, b, si: (b, si, 0)),   # x
                pl.BlockSpec((1, H, 3 * gd), lambda gi, b, si: (gi, 0, 0)),    # wqkv
                pl.BlockSpec((1, 1, 3 * gd), lambda gi, b, si: (gi, 0, 0)),    # bqkv
                pl.BlockSpec((block_s, gd), lambda gi, b, si: (si, 0)),        # cos
                pl.BlockSpec((block_s, gd), lambda gi, b, si: (si, 0)),        # sin_a
                pl.BlockSpec((block_s, gd), lambda gi, b, si: (si, 0)),        # sin_b
            ],
            out_specs=(head_out, head_out, head_out)),
        compiler_params=cparams(("parallel", "parallel", "parallel")),
    )(x, wqkv, bqkv, cos_g, sa_g, sb_g)

    # ---- 2) flash attention (causal, online softmax, clamped KV DMA) --------
    G = B * NH
    qf = q4.reshape(G, S, DH)
    kf = k4.reshape(G, S, DH)
    vf = v4.reshape(G, S, DH)
    nq, nkv = S // block_q, S // block_kv

    def kv_index(gi, qi, ki):
        # Clamp to the last causally-live kv block for this q tile so that
        # skipped steps reuse the resident block (no wasted K/V HBM traffic).
        last = (qi * block_q + block_q - 1) // block_kv
        return (gi, jnp.minimum(ki, last), 0)

    ctx = pl.pallas_call(
        functools.partial(_flash_kernel, block_q=block_q, block_kv=block_kv),
        out_shape=jax.ShapeDtypeStruct((G, S, DH), jnp.bfloat16),
        grid_spec=pltpu.PrefetchScalarGridSpec(
            num_scalar_prefetch=0,
            grid=(G, nq, nkv),
            in_specs=[
                pl.BlockSpec((1, block_q, DH), lambda gi, qi, ki: (gi, qi, 0)),
                pl.BlockSpec((1, block_kv, DH), kv_index),
                pl.BlockSpec((1, block_kv, DH), kv_index),
            ],
            out_specs=pl.BlockSpec((1, block_q, DH),
                                   lambda gi, qi, ki: (gi, qi, 0)),
            scratch_shapes=[
                pltpu.VMEM((block_q, 1), jnp.float32),    # m
                pltpu.VMEM((block_q, 1), jnp.float32),    # l
                pltpu.VMEM((block_q, DH), jnp.float32),   # acc
            ]),
        compiler_params=cparams(("parallel", "parallel", "arbitrary")),
    )(qf, kf, vf)

    # ---- 3) output projection: one K=H matmul, W_o resident in VMEM ---------
    ctx4 = ctx.reshape(B, NH, S, DH)
    nm = S // block_m
    out = pl.pallas_call(
        functools.partial(_oproj_kernel, num_heads=NH),
        out_shape=jax.ShapeDtypeStruct((B, S, H), hidden_states.dtype),
        grid_spec=pltpu.PrefetchScalarGridSpec(
            num_scalar_prefetch=0,
            grid=(B, nm),
            in_specs=[
                pl.BlockSpec((1, NH, block_m, DH), lambda b, m: (b, 0, m, 0)),
                # Constant index_map -> W_o is DMA'd from HBM exactly once.
                # TODO(synk): for very large H on v7x (64 MiB VMEM), tile the N
                #             dimension of W_o instead of keeping it resident.
                pl.BlockSpec((H, H), lambda b, m: (0, 0)),
                pl.BlockSpec((1, H), lambda b, m: (0, 0)),
            ],
            out_specs=pl.BlockSpec((1, block_m, H), lambda b, m: (b, m, 0))),
        compiler_params=cparams(("parallel", "parallel")),
    )(ctx4, wo, bo)
    return out


# ---------------------------------------------------------------------------
# Rotary tables + pure-JAX reference (mirrors the PyTorch module).
# ---------------------------------------------------------------------------
def rotary_tables(S, DH, base=10000.0):
    inv_freq = 1.0 / (base ** (jnp.arange(0, DH, 2, dtype=jnp.float32) / DH))
    t = jnp.arange(S, dtype=jnp.float32)
    freqs = jnp.einsum("i,j->ij", t, inv_freq)
    emb = jnp.concatenate([freqs, freqs], axis=-1)     # (S, DH)
    return jnp.cos(emb), jnp.sin(emb)


def reference_forward(x, params, cos, sin):
    B, S, H = x.shape
    NH = int(params["num_heads"])
    DH = H // NH
    q = x @ params["wq"] + params["bq"]
    k = x @ params["wk"] + params["bk"]
    v = x @ params["wv"] + params["bv"]
    q = q.reshape(B, S, NH, DH).transpose(0, 2, 1, 3)
    k = k.reshape(B, S, NH, DH).transpose(0, 2, 1, 3)
    v = v.reshape(B, S, NH, DH).transpose(0, 2, 1, 3)

    def rot_half(t):
        return jnp.concatenate([-t[..., DH // 2:], t[..., :DH // 2]], axis=-1)

    c = cos[None, None]
    s = sin[None, None]
    q = q * c + rot_half(q) * s
    k = k * c + rot_half(k) * s

    big_neg = jnp.finfo(jnp.float32).min
    causal = jnp.tril(jnp.ones((S, S), jnp.bool_))
    mask = jnp.where(causal, 0.0, big_neg)[None, None]

    sc = jnp.einsum("bhqd,bhkd->bhqk", q, k) / math.sqrt(DH)
    sc = sc + mask
    sc = jnp.maximum(sc, big_neg)
    p = jax.nn.softmax(sc.astype(jnp.float32), axis=-1)
    ctx = jnp.einsum("bhqk,bhkd->bhqd", p, v)
    ctx = ctx.transpose(0, 2, 1, 3).reshape(B, S, H)
    return ctx @ params["wo"] + params["bo"]


if __name__ == "__main__":
    # Small config consistent with InternLMAttention: hidden=32, heads=4 -> DH=8.
    B, S, H, NH = 2, 32, 32, 4
    DH = H // NH

    key = jax.random.PRNGKey(0)
    keys = jax.random.split(key, 9)
    std = 0.02
    params = {
        "num_heads": NH,
        # weights stored as [in, out] (transposed nn.Linear weight)
        "wq": std * jax.random.normal(keys[0], (H, H), jnp.float32),
        "wk": std * jax.random.normal(keys[1], (H, H), jnp.float32),
        "wv": std * jax.random.normal(keys[2], (H, H), jnp.float32),
        "wo": std * jax.random.normal(keys[3], (H, H), jnp.float32),
        "bq": std * jax.random.normal(keys[4], (1, H), jnp.float32),
        "bk": std * jax.random.normal(keys[5], (1, H), jnp.float32),
        "bv": std * jax.random.normal(keys[6], (1, H), jnp.float32),
        "bo": std * jax.random.normal(keys[7], (1, H), jnp.float32),
    }
    hidden_states = jax.random.normal(keys[8], (B, S, H), jnp.float32)

    # Rotary tables for position_ids = arange(S).
    cos, sin = rotary_tables(S, DH)

    out = internlm_attention(hidden_states, params, cos, sin)
    out = jax.block_until_ready(out)

    ref = reference_forward(hidden_states, params, cos, sin)
    assert out.shape == (B, S, H)
    assert bool(jnp.all(jnp.isfinite(out)))
    err = float(jnp.max(jnp.abs(out - ref)))
    assert bool(jnp.allclose(out, ref, atol=1e-2, rtol=1e-2)), f"max err {err}"

    print("KERNEL_OK")
</pallas_src>

<mosaic_0001>
module attributes {stable_mosaic.version = 11 : i64} {
  func.func @_qkv_rope_kernel(%arg0: i32, %arg1: i32, %arg2: i32, %arg3: memref<1x32x32xbf16, #tpu.memory_space<vmem>>, %arg4: memref<1x32x96xbf16, #tpu.memory_space<vmem>>, %arg5: memref<1x1x96xf32, #tpu.memory_space<vmem>>, %arg6: memref<32x32xf32, #tpu.memory_space<vmem>>, %arg7: memref<32x32xf32, #tpu.memory_space<vmem>>, %arg8: memref<32x32xf32, #tpu.memory_space<vmem>>, %arg9: memref<1x4x32x8xbf16, #tpu.memory_space<vmem>>, %arg10: memref<1x4x32x8xbf16, #tpu.memory_space<vmem>>, %arg11: memref<1x4x32x8xbf16, #tpu.memory_space<vmem>>) attributes {dimension_semantics = [#tpu.dimension_semantics<parallel>, #tpu.dimension_semantics<parallel>, #tpu.dimension_semantics<parallel>], iteration_bounds = array<i64: 1, 2, 1>, scalar_prefetch = 0 : i64, scratch_operands = 0 : i64, tpu.core_type = #tpu.core_type<tc>, window_params = [{transform_indices = @transform_0, window_bounds = array<i64: 1, 32, 32>}, {transform_indices = @transform_1, window_bounds = array<i64: 1, 32, 96>}, {transform_indices = @transform_2, window_bounds = array<i64: 1, 1, 96>}, {transform_indices = @transform_3, window_bounds = array<i64: 32, 32>}, {transform_indices = @transform_4, window_bounds = array<i64: 32, 32>}, {transform_indices = @transform_5, window_bounds = array<i64: 32, 32>}, {transform_indices = @transform_6, window_bounds = array<i64: 1, 4, 32, 8>}, {transform_indices = @transform_7, window_bounds = array<i64: 1, 4, 32, 8>}, {transform_indices = @transform_8, window_bounds = array<i64: 1, 4, 32, 8>}]} {
    %c0 = arith.constant 0 : index
    %c0_0 = arith.constant 0 : index
    %c0_1 = arith.constant 0 : index
    %0 = vector.load %arg3[%c0, %c0_0, %c0_1] : memref<1x32x32xbf16, #tpu.memory_space<vmem>>, vector<1x32x32xbf16>
    %1 = vector.shape_cast %0 : vector<1x32x32xbf16> to vector<32x32xbf16>
    %c0_2 = arith.constant 0 : index
    %c0_3 = arith.constant 0 : index
    %c0_4 = arith.constant 0 : index
    %2 = vector.load %arg4[%c0_2, %c0_3, %c0_4] : memref<1x32x96xbf16, #tpu.memory_space<vmem>>, vector<1x32x96xbf16>
    %3 = vector.shape_cast %2 : vector<1x32x96xbf16> to vector<32x96xbf16>
    %cst = arith.constant dense<0.000000e+00> : vector<32x96xf32>
    %4 = tpu.matmul %1, %3, %cst {dimension_numbers = #tpu.dot_dimension_numbers<[1], [0], [0], [1], [0, 0, 1, 1], [], []>} : vector<32x32xbf16>, vector<32x96xbf16>, vector<32x96xf32> -> vector<32x96xf32>
    %c0_5 = arith.constant 0 : index
    %c0_6 = arith.constant 0 : index
    %c0_7 = arith.constant 0 : index
    %5 = vector.load %arg5[%c0_5, %c0_6, %c0_7] : memref<1x1x96xf32, #tpu.memory_space<vmem>>, vector<1x1x96xf32>
    %6 = vector.shape_cast %5 : vector<1x1x96xf32> to vector<1x96xf32>
    %7 = vector.broadcast %6 : vector<1x96xf32> to vector<32x96xf32>
    %8 = arith.addf %4, %7 : vector<32x96xf32>
    %9 = vector.extract_strided_slice %8 {offsets = [0, 0], sizes = [32, 32], strides = [1, 1]} : vector<32x96xf32> to vector<32x32xf32>
    %10 = vector.extract_strided_slice %8 {offsets = [0, 32], sizes = [32, 32], strides = [1, 1]} : vector<32x96xf32> to vector<32x32xf32>
    %11 = vector.extract_strided_slice %8 {offsets = [0, 64], sizes = [32, 32], strides = [1, 1]} : vector<32x96xf32> to vector<32x32xf32>
    %c0_8 = arith.constant 0 : index
    %c0_9 = arith.constant 0 : index
    %12 = vector.load %arg6[%c0_8, %c0_9] : memref<32x32xf32, #tpu.memory_space<vmem>>, vector<32x32xf32>
    %c0_10 = arith.constant 0 : index
    %c0_11 = arith.constant 0 : index
    %13 = vector.load %arg7[%c0_10, %c0_11] : memref<32x32xf32, #tpu.memory_space<vmem>>, vector<32x32xf32>
    %c0_12 = arith.constant 0 : index
    %c0_13 = arith.constant 0 : index
    %14 = vector.load %arg8[%c0_12, %c0_13] : memref<32x32xf32, #tpu.memory_space<vmem>>, vector<32x32xf32>
    %15 = arith.addf %13, %14 : vector<32x32xf32>
    %16 = arith.mulf %9, %12 : vector<32x32xf32>
    %17 = vector.extract_strided_slice %9 {offsets = [0, 0], sizes = [32, 8], strides = [1, 1]} : vector<32x32xf32> to vector<32x8xf32>
    %18 = vector.extract_strided_slice %17 {offsets = [0, 4], sizes = [32, 4], strides = [1, 1]} : vector<32x8xf32> to vector<32x4xf32>
    %19 = vector.extract_strided_slice %17 {offsets = [0, 0], sizes = [32, 4], strides = [1, 1]} : vector<32x8xf32> to vector<32x4xf32>
    %20 = tpu.concatenate %18, %19 in 1 : vector<32x4xf32>, vector<32x4xf32> -> vector<32x8xf32>
    %21 = vector.extract_strided_slice %9 {offsets = [0, 8], sizes = [32, 8], strides = [1, 1]} : vector<32x32xf32> to vector<32x8xf32>
    %22 = vector.extract_strided_slice %21 {offsets = [0, 4], sizes = [32, 4], strides = [1, 1]} : vector<32x8xf32> to vector<32x4xf32>
    %23 = vector.extract_strided_slice %21 {offsets = [0, 0], sizes = [32, 4], strides = [1, 1]} : vector<32x8xf32> to vector<32x4xf32>
    %24 = tpu.concatenate %22, %23 in 1 : vector<32x4xf32>, vector<32x4xf32> -> vector<32x8xf32>
    %25 = vector.extract_strided_slice %9 {offsets = [0, 16], sizes = [32, 8], strides = [1, 1]} : vector<32x32xf32> to vector<32x8xf32>
    %26 = vector.extract_strided_slice %25 {offsets = [0, 4], sizes = [32, 4], strides = [1, 1]} : vector<32x8xf32> to vector<32x4xf32>
    %27 = vector.extract_strided_slice %25 {offsets = [0, 0], sizes = [32, 4], strides = [1, 1]} : vector<32x8xf32> to vector<32x4xf32>
    %28 = tpu.concatenate %26, %27 in 1 : vector<32x4xf32>, vector<32x4xf32> -> vector<32x8xf32>
    %29 = vector.extract_strided_slice %9 {offsets = [0, 24], sizes = [32, 8], strides = [1, 1]} : vector<32x32xf32> to vector<32x8xf32>
    %30 = vector.extract_strided_slice %29 {offsets = [0, 4], sizes = [32, 4], strides = [1, 1]} : vector<32x8xf32> to vector<32x4xf32>
    %31 = vector.extract_strided_slice %29 {offsets = [0, 0], sizes = [32, 4], strides = [1, 1]} : vector<32x8xf32> to vector<32x4xf32>
    %32 = tpu.concatenate %30, %31 in 1 : vector<32x4xf32>, vector<32x4xf32> -> vector<32x8xf32>
    %33 = tpu.concatenate %20, %24, %28, %32 in 1 : vector<32x8xf32>, vector<32x8xf32>, vector<32x8xf32>, vector<32x8xf32> -> vector<32x32xf32>
    %34 = arith.mulf %33, %15 : vector<32x32xf32>
    %35 = arith.addf %16, %34 : vector<32x32xf32>
    %36 = arith.mulf %10, %12 : vector<32x32xf32>
    %37 = vector.extract_strided_slice %10 {offsets = [0, 0], sizes = [32, 8], strides = [1, 1]} : vector<32x32xf32> to vector<32x8xf32>
    %38 = vector.extract_strided_slice %37 {offsets = [0, 4], sizes = [32, 4], strides = [1, 1]} : vector<32x8xf32> to vector<32x4xf32>
    %39 = vector.extract_strided_slice %37 {offsets = [0, 0], sizes = [32, 4], strides = [1, 1]} : vector<32x8xf32> to vector<32x4xf32>
    %40 = tpu.concatenate %38, %39 in 1 : vector<32x4xf32>, vector<32x4xf32> -> vector<32x8xf32>
    %41 = vector.extract_strided_slice %10 {offsets = [0, 8], sizes = [32, 8], strides = [1, 1]} : vector<32x32xf32> to vector<32x8xf32>
    %42 = vector.extract_strided_slice %41 {offsets = [0, 4], sizes = [32, 4], strides = [1, 1]} : vector<32x8xf32> to vector<32x4xf32>
    %43 = vector.extract_strided_slice %41 {offsets = [0, 0], sizes = [32, 4], strides = [1, 1]} : vector<32x8xf32> to vector<32x4xf32>
    %44 = tpu.concatenate %42, %43 in 1 : vector<32x4xf32>, vector<32x4xf32> -> vector<32x8xf32>
    %45 = vector.extract_strided_slice %10 {offsets = [0, 16], sizes = [32, 8], strides = [1, 1]} : vector<32x32xf32> to vector<32x8xf32>
    %46 = vector.extract_strided_slice %45 {offsets = [0, 4], sizes = [32, 4], strides = [1, 1]} : vector<32x8xf32> to vector<32x4xf32>
    %47 = vector.extract_strided_slice %45 {offsets = [0, 0], sizes = [32, 4], strides = [1, 1]} : vector<32x8xf32> to vector<32x4xf32>
    %48 = tpu.concatenate %46, %47 in 1 : vector<32x4xf32>, vector<32x4xf32> -> vector<32x8xf32>
    %49 = vector.extract_strided_slice %10 {offsets = [0, 24], sizes = [32, 8], strides = [1, 1]} : vector<32x32xf32> to vector<32x8xf32>
    %50 = vector.extract_strided_slice %49 {offsets = [0, 4], sizes = [32, 4], strides = [1, 1]} : vector<32x8xf32> to vector<32x4xf32>
    %51 = vector.extract_strided_slice %49 {offsets = [0, 0], sizes = [32, 4], strides = [1, 1]} : vector<32x8xf32> to vector<32x4xf32>
    %52 = tpu.concatenate %50, %51 in 1 : vector<32x4xf32>, vector<32x4xf32> -> vector<32x8xf32>
    %53 = tpu.concatenate %40, %44, %48, %52 in 1 : vector<32x8xf32>, vector<32x8xf32>, vector<32x8xf32>, vector<32x8xf32> -> vector<32x32xf32>
    %54 = arith.mulf %53, %15 : vector<32x32xf32>
    %55 = arith.addf %36, %54 : vector<32x32xf32>
    %56 = vector.extract_strided_slice %35 {offsets = [0, 0], sizes = [32, 8], strides = [1, 1]} : vector<32x32xf32> to vector<32x8xf32>
    %57 = arith.truncf %56 : vector<32x8xf32> to vector<32x8xbf16>
    %c0_14 = arith.constant 0 : index
    %c0_15 = arith.constant 0 : index
    %c0_16 = arith.constant 0 : index
    %c0_17 = arith.constant 0 : index
    %58 = vector.load %arg9[%c0_14, %c0_15, %c0_16, %c0_17] : memref<1x4x32x8xbf16, #tpu.memory_space<vmem>>, vector<1x1x32x8xbf16>
    %59 = vector.shape_cast %58 : vector<1x1x32x8xbf16> to vector<32x8xbf16>
    %60 = vector.shape_cast %57 : vector<32x8xbf16> to vector<1x1x32x8xbf16>
    tpu.vector_store %arg9[%c0_14, %c0_15, %c0_16, %c0_17], %60 {strides = array<i32>} : memref<1x4x32x8xbf16, #tpu.memory_space<vmem>>, vector<1x1x32x8xbf16>,
    %61 = vector.extract_strided_slice %55 {offsets = [0, 0], sizes = [32, 8], strides = [1, 1]} : vector<32x32xf32> to vector<32x8xf32>
    %62 = arith.truncf %61 : vector<32x8xf32> to vector<32x8xbf16>
    %c0_18 = arith.constant 0 : index
    %c0_19 = arith.constant 0 : index
    %c0_20 = arith.constant 0 : index
    %c0_21 = arith.constant 0 : index
    %63 = vector.load %arg10[%c0_18, %c0_19, %c0_20, %c0_21] : memref<1x4x32x8xbf16, #tpu.memory_space<vmem>>, vector<1x1x32x8xbf16>
    %64 = vector.shape_cast %63 : vector<1x1x32x8xbf16> to vector<32x8xbf16>
    %65 = vector.shape_cast %62 : vector<32x8xbf16> to vector<1x1x32x8xbf16>
    tpu.vector_store %arg10[%c0_18, %c0_19, %c0_20, %c0_21], %65 {strides = array<i32>} : memref<1x4x32x8xbf16, #tpu.memory_space<vmem>>, vector<1x1x32x8xbf16>,
    %66 = vector.extract_strided_slice %11 {offsets = [0, 0], sizes = [32, 8], strides = [1, 1]} : vector<32x32xf32> to vector<32x8xf32>
    %67 = arith.truncf %66 : vector<32x8xf32> to vector<32x8xbf16>
    %c0_22 = arith.constant 0 : index
    %c0_23 = arith.constant 0 : index
    %c0_24 = arith.constant 0 : index
    %c0_25 = arith.constant 0 : index
    %68 = vector.load %arg11[%c0_22, %c0_23, %c0_24, %c0_25] : memref<1x4x32x8xbf16, #tpu.memory_space<vmem>>, vector<1x1x32x8xbf16>
    %69 = vector.shape_cast %68 : vector<1x1x32x8xbf16> to vector<32x8xbf16>
    %70 = vector.shape_cast %67 : vector<32x8xbf16> to vector<1x1x32x8xbf16>
    tpu.vector_store %arg11[%c0_22, %c0_23, %c0_24, %c0_25], %70 {strides = array<i32>} : memref<1x4x32x8xbf16, #tpu.memory_space<vmem>>, vector<1x1x32x8xbf16>,
    %71 = vector.extract_strided_slice %35 {offsets = [0, 8], sizes = [32, 8], strides = [1, 1]} : vector<32x32xf32> to vector<32x8xf32>
    %72 = arith.truncf %71 : vector<32x8xf32> to vector<32x8xbf16>
    %c0_26 = arith.constant 0 : index
    %c1 = arith.constant 1 : index
    %c0_27 = arith.constant 0 : index
    %c0_28 = arith.constant 0 : index
    %73 = vector.load %arg9[%c0_26, %c1, %c0_27, %c0_28] : memref<1x4x32x8xbf16, #tpu.memory_space<vmem>>, vector<1x1x32x8xbf16>
    %74 = vector.shape_cast %73 : vector<1x1x32x8xbf16> to vector<32x8xbf16>
    %75 = vector.shape_cast %72 : vector<32x8xbf16> to vector<1x1x32x8xbf16>
    tpu.vector_store %arg9[%c0_26, %c1, %c0_27, %c0_28], %75 {strides = array<i32>} : memref<1x4x32x8xbf16, #tpu.memory_space<vmem>>, vector<1x1x32x8xbf16>,
    %76 = vector.extract_strided_slice %55 {offsets = [0, 8], sizes = [32, 8], strides = [1, 1]} : vector<32x32xf32> to vector<32x8xf32>
    %77 = arith.truncf %76 : vector<32x8xf32> to vector<32x8xbf16>
    %c0_29 = arith.constant 0 : index
    %c1_30 = arith.constant 1 : index
    %c0_31 = arith.constant 0 : index
    %c0_32 = arith.constant 0 : index
    %78 = vector.load %arg10[%c0_29, %c1_30, %c0_31, %c0_32] : memref<1x4x32x8xbf16, #tpu.memory_space<vmem>>, vector<1x1x32x8xbf16>
    %79 = vector.shape_cast %78 : vector<1x1x32x8xbf16> to vector<32x8xbf16>
    %80 = vector.shape_cast %77 : vector<32x8xbf16> to vector<1x1x32x8xbf16>
    tpu.vector_store %arg10[%c0_29, %c1_30, %c0_31, %c0_32], %80 {strides = array<i32>} : memref<1x4x32x8xbf16, #tpu.memory_space<vmem>>, vector<1x1x32x8xbf16>,
    %81 = vector.extract_strided_slice %11 {offsets = [0, 8], sizes = [32, 8], strides = [1, 1]} : vector<32x32xf32> to vector<32x8xf32>
    %82 = arith.truncf %81 : vector<32x8xf32> to vector<32x8xbf16>
    %c0_33 = arith.constant 0 : index
    %c1_34 = arith.constant 1 : index
    %c0_35 = arith.constant 0 : index
    %c0_36 = arith.constant 0 : index
    %83 = vector.load %arg11[%c0_33, %c1_34, %c0_35, %c0_36] : memref<1x4x32x8xbf16, #tpu.memory_space<vmem>>, vector<1x1x32x8xbf16>
    %84 = vector.shape_cast %83 : vector<1x1x32x8xbf16> to vector<32x8xbf16>
    %85 = vector.shape_cast %82 : vector<32x8xbf16> to vector<1x1x32x8xbf16>
    tpu.vector_store %arg11[%c0_33, %c1_34, %c0_35, %c0_36], %85 {strides = array<i32>} : memref<1x4x32x8xbf16, #tpu.memory_space<vmem>>, vector<1x1x32x8xbf16>,
    %86 = vector.extract_strided_slice %35 {offsets = [0, 16], sizes = [32, 8], strides = [1, 1]} : vector<32x32xf32> to vector<32x8xf32>
    %87 = arith.truncf %86 : vector<32x8xf32> to vector<32x8xbf16>
    %c0_37 = arith.constant 0 : index
    %c2 = arith.constant 2 : index
    %c0_38 = arith.constant 0 : index
    %c0_39 = arith.constant 0 : index
    %88 = vector.load %arg9[%c0_37, %c2, %c0_38, %c0_39] : memref<1x4x32x8xbf16, #tpu.memory_space<vmem>>, vector<1x1x32x8xbf16>
    %89 = vector.shape_cast %88 : vector<1x1x32x8xbf16> to vector<32x8xbf16>
    %90 = vector.shape_cast %87 : vector<32x8xbf16> to vector<1x1x32x8xbf16>
    tpu.vector_store %arg9[%c0_37, %c2, %c0_38, %c0_39], %90 {strides = array<i32>} : memref<1x4x32x8xbf16, #tpu.memory_space<vmem>>, vector<1x1x32x8xbf16>,
    %91 = vector.extract_strided_slice %55 {offsets = [0, 16], sizes = [32, 8], strides = [1, 1]} : vector<32x32xf32> to vector<32x8xf32>
    %92 = arith.truncf %91 : vector<32x8xf32> to vector<32x8xbf16>
    %c0_40 = arith.constant 0 : index
    %c2_41 = arith.constant 2 : index
    %c0_42 = arith.constant 0 : index
    %c0_43 = arith.constant 0 : index
    %93 = vector.load %arg10[%c0_40, %c2_41, %c0_42, %c0_43] : memref<1x4x32x8xbf16, #tpu.memory_space<vmem>>, vector<1x1x32x8xbf16>
    %94 = vector.shape_cast %93 : vector<1x1x32x8xbf16> to vector<32x8xbf16>
    %95 = vector.shape_cast %92 : vector<32x8xbf16> to vector<1x1x32x8xbf16>
    tpu.vector_store %arg10[%c0_40, %c2_41, %c0_42, %c0_43], %95 {strides = array<i32>} : memref<1x4x32x8xbf16, #tpu.memory_space<vmem>>, vector<1x1x32x8xbf16>,
    %96 = vector.extract_strided_slice %11 {offsets = [0, 16], sizes = [32, 8], strides = [1, 1]} : vector<32x32xf32> to vector<32x8xf32>
    %97 = arith.truncf %96 : vector<32x8xf32> to vector<32x8xbf16>
    %c0_44 = arith.constant 0 : index
    %c2_45 = arith.constant 2 : index
    %c0_46 = arith.constant 0 : index
    %c0_47 = arith.constant 0 : index
    %98 = vector.load %arg11[%c0_44, %c2_45, %c0_46, %c0_47] : memref<1x4x32x8xbf16, #tpu.memory_space<vmem>>, vector<1x1x32x8xbf16>
    %99 = vector.shape_cast %98 : vector<1x1x32x8xbf16> to vector<32x8xbf16>
    %100 = vector.shape_cast %97 : vector<32x8xbf16> to vector<1x1x32x8xbf16>
    tpu.vector_store %arg11[%c0_44, %c2_45, %c0_46, %c0_47], %100 {strides = array<i32>} : memref<1x4x32x8xbf16, #tpu.memory_space<vmem>>, vector<1x1x32x8xbf16>,
    %101 = vector.extract_strided_slice %35 {offsets = [0, 24], sizes = [32, 8], strides = [1, 1]} : vector<32x32xf32> to vector<32x8xf32>
    %102 = arith.truncf %101 : vector<32x8xf32> to vector<32x8xbf16>
    %c0_48 = arith.constant 0 : index
    %c3 = arith.constant 3 : index
    %c0_49 = arith.constant 0 : index
    %c0_50 = arith.constant 0 : index
    %103 = vector.load %arg9[%c0_48, %c3, %c0_49, %c0_50] : memref<1x4x32x8xbf16, #tpu.memory_space<vmem>>, vector<1x1x32x8xbf16>
    %104 = vector.shape_cast %103 : vector<1x1x32x8xbf16> to vector<32x8xbf16>
    %105 = vector.shape_cast %102 : vector<32x8xbf16> to vector<1x1x32x8xbf16>
    tpu.vector_store %arg9[%c0_48, %c3, %c0_49, %c0_50], %105 {strides = array<i32>} : memref<1x4x32x8xbf16, #tpu.memory_space<vmem>>, vector<1x1x32x8xbf16>,
    %106 = vector.extract_strided_slice %55 {offsets = [0, 24], sizes = [32, 8], strides = [1, 1]} : vector<32x32xf32> to vector<32x8xf32>
    %107 = arith.truncf %106 : vector<32x8xf32> to vector<32x8xbf16>
    %c0_51 = arith.constant 0 : index
    %c3_52 = arith.constant 3 : index
    %c0_53 = arith.constant 0 : index
    %c0_54 = arith.constant 0 : index
    %108 = vector.load %arg10[%c0_51, %c3_52, %c0_53, %c0_54] : memref<1x4x32x8xbf16, #tpu.memory_space<vmem>>, vector<1x1x32x8xbf16>
    %109 = vector.shape_cast %108 : vector<1x1x32x8xbf16> to vector<32x8xbf16>
    %110 = vector.shape_cast %107 : vector<32x8xbf16> to vector<1x1x32x8xbf16>
    tpu.vector_store %arg10[%c0_51, %c3_52, %c0_53, %c0_54], %110 {strides = array<i32>} : memref<1x4x32x8xbf16, #tpu.memory_space<vmem>>, vector<1x1x32x8xbf16>,
    %111 = vector.extract_strided_slice %11 {offsets = [0, 24], sizes = [32, 8], strides = [1, 1]} : vector<32x32xf32> to vector<32x8xf32>
    %112 = arith.truncf %111 : vector<32x8xf32> to vector<32x8xbf16>
    %c0_55 = arith.constant 0 : index
    %c3_56 = arith.constant 3 : index
    %c0_57 = arith.constant 0 : index
    %c0_58 = arith.constant 0 : index
    %113 = vector.load %arg11[%c0_55, %c3_56, %c0_57, %c0_58] : memref<1x4x32x8xbf16, #tpu.memory_space<vmem>>, vector<1x1x32x8xbf16>
    %114 = vector.shape_cast %113 : vector<1x1x32x8xbf16> to vector<32x8xbf16>
    %115 = vector.shape_cast %112 : vector<32x8xbf16> to vector<1x1x32x8xbf16>
    tpu.vector_store %arg11[%c0_55, %c3_56, %c0_57, %c0_58], %115 {strides = array<i32>} : memref<1x4x32x8xbf16, #tpu.memory_space<vmem>>, vector<1x1x32x8xbf16>,
    return
  }
  func.func @transform_0(%arg0: i32, %arg1: i32, %arg2: i32) -> (i32, i32, i32) {
    %c0_i32 = arith.constant 0 : i32
    %c0_i32_0 = arith.constant 0 : i32
    return %arg1, %arg2, %c0_i32 : i32, i32, i32
  }
  func.func @transform_1(%arg0: i32, %arg1: i32, %arg2: i32) -> (i32, i32, i32) {
    %c0_i32 = arith.constant 0 : i32
    %c0_i32_0 = arith.constant 0 : i32
    %c0_i32_1 = arith.constant 0 : i32
    return %arg0, %c0_i32, %c0_i32_0 : i32, i32, i32
  }
  func.func @transform_2(%arg0: i32, %arg1: i32, %arg2: i32) -> (i32, i32, i32) {
    %c0_i32 = arith.constant 0 : i32
    %c0_i32_0 = arith.constant 0 : i32
    %c0_i32_1 = arith.constant 0 : i32
    return %arg0, %c0_i32, %c0_i32_0 : i32, i32, i32
  }
  func.func @transform_3(%arg0: i32, %arg1: i32, %arg2: i32) -> (i32, i32) {
    %c0_i32 = arith.constant 0 : i32
    %c0_i32_0 = arith.constant 0 : i32
    return %arg2, %c0_i32 : i32, i32
  }
  func.func @transform_4(%arg0: i32, %arg1: i32, %arg2: i32) -> (i32, i32) {
    %c0_i32 = arith.constant 0 : i32
    %c0_i32_0 = arith.constant 0 : i32
    return %arg2, %c0_i32 : i32, i32
  }
  func.func @transform_5(%arg0: i32, %arg1: i32, %arg2: i32) -> (i32, i32) {
    %c0_i32 = arith.constant 0 : i32
    %c0_i32_0 = arith.constant 0 : i32
    return %arg2, %c0_i32 : i32, i32
  }
  func.func @transform_6(%arg0: i32, %arg1: i32, %arg2: i32) -> (i32, i32, i32, i32) {
    %c0_i32 = arith.constant 0 : i32
    %c0_i32_0 = arith.constant 0 : i32
    return %arg1, %arg0, %arg2, %c0_i32 : i32, i32, i32, i32
  }
  func.func @transform_7(%arg0: i32, %arg1: i32, %arg2: i32) -> (i32, i32, i32, i32) {
    %c0_i32 = arith.constant 0 : i32
    %c0_i32_0 = arith.constant 0 : i32
    return %arg1, %arg0, %arg2, %c0_i32 : i32, i32, i32, i32
  }
  func.func @transform_8(%arg0: i32, %arg1: i32, %arg2: i32) -> (i32, i32, i32, i32) {
    %c0_i32 = arith.constant 0 : i32
    %c0_i32_0 = arith.constant 0 : i32
    return %arg1, %arg0, %arg2, %c0_i32 : i32, i32, i32, i32
  }
}

</mosaic_0001>

<bundles_post_ra>
// kernel: tpu_custom_call.1
= control target key start
LH: loop header
LB: loop body
LE: loop exit
PB: predicated region body
PF: predicated region fallthrough
CT: control target
= control target key end

     0   :  { %s2558_s0 = inlined_call_operand.hbm [shape: bf16[2,32,32], index: 0, kind: input, shape index: {}]   ;;  %s2559_s1 = inlined_call_operand.hbm [shape: bf16[1,32,96], index: 1, kind: input, shape index: {}]   ;;  %s2560_s2 = inlined_call_operand.vmem [shape: f32[1,1,96], index: 2, kind: input, shape index: {}]   ;;  %s2561_s3 = inlined_call_operand.hbm [shape: f32[32,32], index: 3, kind: input, shape index: {}]   ;;  %s2562_s4 = inlined_call_operand.hbm [shape: f32[32,32], index: 4, kind: input, shape index: {}]   ;;  %s2563_s5 = inlined_call_operand.hbm [shape: f32[32,32], index: 5, kind: input, shape index: {}]   ;;  %s2564_s6 = inlined_call_operand.vmem [shape: bf16[2,4,32,8], index: 6, kind: output, shape index: {0}]   ;;  %s2565_s7 = inlined_call_operand.vmem [shape: bf16[2,4,32,8], index: 7, kind: output, shape index: {1}]   ;;  %s2566_s8 = inlined_call_operand.vmem [shape: bf16[2,4,32,8], index: 8, kind: output, shape index: {2}]  }
   0x1   :  { %2569 = sst [smem:[#allocation13_spill]] %s2559_s1 }
   0x2   :  { %2570 = sst [smem:[#allocation14_spill]] %s2561_s3 }
   0x3   :  { %2571 = sst [smem:[#allocation15_spill]] %s2562_s4 }
   0x4   :  { %14 = vsyncpa [#allocation3], 0 }
   0x5   :  { %16 = vsyncpa [#allocation3 + $0x1], 0 }
   0x6   :  { %17 = vsyncpa [#allocation5], 0 }
   0x7   :  { %18 = vsyncpa [#allocation8], 0  ;;  %s1994_s27 = smov 0   ;;  %s1996_s28 = smov 0  }
   0x8   :  { %s1998_s29 = smov 0   ;;  %s2000_s30 = smov 0  }
   0x9   :  { %s2002_s9 = smov 0   ;;  %s2004_s10 = smov 0  }
   0xa LB: > { %s1492_s11 = sadd.s32 4294967295, %s1915_s10   ;;  %p65_p0 = scmp.ne.s32.totalorder %s1899_s28, %s1895_s27  ;;  %s1915_s10 = sphi %s2004_s10, %s24_s10   ;;  %s1911_s9 = sphi %s2002_s9, %s2586_s9   ;;  %s1907_s30 = sphi %s2000_s30, %s2585_s30   ;;  %s1903_s29 = sphi %s1998_s29, %s2584_s29   ;;  %s1899_s28 = sphi %s1996_s28, %s2583_s28   ;;  %s1895_s27 = sphi %s1994_s27, %s2582_s27  }
   0xb   : > { %p2024_p1 = scmp.eq.s32.totalorder %s1492_s11, 0  ;;  %p1494_p2 = scmp.ge.s32.totalorder %s1915_s10, 1 }
   0xc   : > { %p296_p3 = scmp.lt.s32.totalorder %s1915_s10, 3  ;;  %s2574_s1 = sld [smem:[#allocation13_spill]] }
   0xd   : > { %p2032_p4 = por %p2024_p1, %p65_p0  ;;  %s1917_s18 = smov [#allocation4]  }
   0xe   : > { %p2039_p5 = pnand %p1494_p2, %p296_p3  ;;  %s312_s19 = sshll.u32 %s1917_s18, 4  ;;  %s313_s19 = int_to_ptr.vmem [resolvable:$true] %s312_s19 }
   0xf   : > { %s2577_s4 = sld [smem:[#allocation15_spill]]  ;;  %s2567_s24 = smov 64  }
  0x10   : > { %p1600_p6 = pneg %p2039_p5  ;;  %s2568_s25 = smov 4  }
  0x11   : > { %s1920_s26 = smov [#allocation7]   ;;  %s2578_s3 = sld [smem:[#allocation14_spill]] }
  0x12   : > { %s310_s16 = sshll.u32 %s2574_s1, 4  ;;  %p2047_p7 = pnand %p1600_p6, %p2024_p1  ;;  %s311_s16 = int_to_ptr.hbm [resolvable:$true] %s310_s16 }
  0x13   : > { %s352_s27 = sshll.u32 %s1920_s26, 4  ;;  %s1921_s18 = smov 128   ;;  %s353_s27 = int_to_ptr.vmem [resolvable:$true] %s352_s27 }
  0x14   : > { %1603 = dma.hbm_to_vmem [thread:$0]  (!%p2047_p7), %s311_s16, 256, %s313_s19, [#allocation5], %s2567_s24, %s2567_s24, %s2568_s25  }
  0x15   : > { %s350_s23 = sshll.u32 %s2577_s4, 4  ;;  %s1922_s21 = smov 8   ;;  %s351_s23 = int_to_ptr.hbm [resolvable:$true] %s350_s23 }
  0x16   : > { %1609 = dma.hbm_to_vmem [thread:$0]  (!%p2047_p7), %s351_s23, 512, %s353_s27, [#allocation8], %s1921_s18, %s1921_s18, %s1922_s21  }
  0x17   : > { %s333_s15 = sshll.u32 %s2578_s3, 4  ;;  %s367_s22 = sshll.u32 %s2563_s5, 4  ;;  %s334_s15 = int_to_ptr.hbm [resolvable:$true] %s333_s15  ;;  %s368_s22 = int_to_ptr.hbm [resolvable:$true] %s367_s22 }
  0x18   : > { %s1923_s26 = smov [#allocation6]   ;;  %s1924_s14 = smov [#allocation9]  }
  0x19   : > { %s335_s11 = sshll.u32 %s1923_s26, 4  ;;  %s369_s24 = sshll.u32 %s1924_s14, 4  ;;  %s336_s11 = int_to_ptr.vmem [resolvable:$true] %s335_s11  ;;  %s370_s24 = int_to_ptr.vmem [resolvable:$true] %s369_s24 }
  0x1a   : > { %1606 = dma.hbm_to_vmem [thread:$0]  (!%p2047_p7), %s334_s15, 512, %s336_s11, [#allocation5], %s1921_s18, %s1921_s18, %s1922_s21  }
  0x1b   : > { %1612 = dma.hbm_to_vmem [thread:$0]  (!%p2047_p7), %s368_s22, 512, %s370_s24, [#allocation8], %s1921_s18, %s1921_s18, %s1922_s21  }
  0x1c   : > { %s39_s23 = sadd.s32 1, %s1911_s9  ;;  %s52_s27 = sadd.s32 1, %s1903_s29 }
  0x1d   : > { %p41_p8 = scmp.ge.s32.totalorder %s39_s23, 2  ;;  %p59_p9 = scmp.ne.s32.totalorder %s1903_s29, %s1899_s28 }
  0x1e   : > { %p60_p10 = scmp.eq.s32.totalorder %s1915_s10, 0  ;;  %p1621_p11 = scmp.lt.s32.totalorder %s1915_s10, 2 }
  0x1f   : > { %s2588_s23 = smov (%p41_p8, %s39_s23), 0  ;;  %s383_s15 = sand.u32 1, %s1903_s29  }
  0x20   : > { %p2079_p12 = por %p60_p10, %p59_p9  ;;  %s47_s19 = ssub.s32 %s1911_s9, %s2588_s23 }
  0x21   : > { %p50_p13 = scmp.eq.s32.totalorder %s47_s19, 0  ;;  %s1501_s20 = sshll.u32 %s383_s15, 4 }
  0x22   : > { %s1572_s24 = sshll.u32 %s1911_s9, 4  ;;  %s387_s11 = scalar_lea.vmem [#allocation2], %s1501_s20 }
  0x23   : > { %s2088_s18 = scalar_select %p50_p13, %s1903_s29, %s52_s27  }
  0x24   : > { %s394_s26 = scalar_lea.hbm %s2558_s0, %s1572_s24  ;;  %s397_s14 = sshll.u32 %s387_s11, 4  ;;  %s398_s14 = int_to_ptr.vmem [resolvable:$true] %s397_s14 }
  0x25   : > { %s395_s25 = sshll.u32 %s394_s26, 4  ;;  %p1614_p0 = pnand %p1621_p11, %p2079_p12  ;;  %s396_s25 = int_to_ptr.hbm [resolvable:$true] %s395_s25 }
  0x26   : > { %s384_s1 = scalar_lea.sflag [#allocation3], %s383_s15  ;;  %s2580_s3 = smov 4  }
  0x27   : > { %s2581_s4 = smov 64   ;;  %409 = sbr.rel (%p2039_p5) target bundleno = 783 (0x30f), region = 44 }
  0x28   : > { %1616 = dma.hbm_to_vmem [thread:$0]  (!%p1614_p0), %s396_s25, 256, %s398_s14, %s384_s1, %s2581_s4, %s2581_s4, %s2580_s3  }
  0x29   : > { %s411_s27 = sand.u32 (!%p2039_p5), 1, %s1899_s28  }
  0x2a   : > { %s1505_s19 = sshll.u32 (!%p2039_p5), %s411_s27, 4  ;;  %s412_s20 = scalar_lea.sflag (!%p2039_p5), [#allocation3], %s411_s27 }
  0x2b   : > { %s415_s24 = scalar_lea.vmem (!%p2039_p5), [#allocation2], %s1505_s19 }
  0x2c   : > { %1882 = dma.done.wait (%p2032_p4), %s412_s20, 256  }
  0x2d   : > { %1884 = vsyncadd (%p2032_p4), %s412_s20, 4294967040 }
  0x2e   : > { %1886 = dma.done.wait (%p2024_p1), [#allocation5], 768  }
  0x2f   : > { %1888 = vsyncadd (%p2024_p1), [#allocation5], 4294966528 }
  0x30   : > { %1890 = dma.done.wait (%p2024_p1), [#allocation8], 1024  }
  0x31   : > { %1892 = vsyncadd (%p2024_p1), [#allocation8], 4294966272  ;;  %v1579_v0 = vld [vmem:[#allocation4 + $0x8] sm:$0xff]  ;;  %v2115_v1 = vld [vmem:[#allocation6 + $0x10] sm:$0xff]  ;;  %s1925_s1 = smov 32   ;;  %vm599_vm0 = vcmask 261120  }
  0x32   : > { %v2117_v2 = vld [vmem:[#allocation6 + $0x8] sm:$0xff]  ;;  %612 = vmatpush.bf16.msra.mxu0 %v1579_v0  ;;  %1580 = vmatpush.bf16.msra.mxu1 %v1579_v0  ;;  %v1578_v3 = vld [vmem:[#allocation4] sm:$0xff]  ;;  %v2119_v4 = vld [vmem:[#allocation6] sm:$0xff]  ;;  %s1926_s12 = smov 124   ;;  %s1927_s13 = smov 4   ;;  %vm673_vm1 = vcmask 31744  }
  0x33   : > { %805 = vrot.lane.b32.xlu1 %v2115_v1, %s1925_s1  ;;  %803 = vrot.lane.b32.xlu0 %v2117_v2, %s1925_s1  ;;  %v1576_v5 = vld [vmem:[%s415_s24] sm:$0xff]  ;;  %v1577_v6 = vld [vmem:[%s415_s24 + $0x8] sm:$0xff]  ;;  %s1928_s17 = smov 116   ;;  %s1929_s25 = smov 100   ;;  %vm969_vm2 = vcmask 60416   ;;  %vm774_vm3 = vcmask 64512  }
  0x34   : > { %801 = vrot.lane.b32.xlu2 %v2119_v4, %s1925_s1  ;;  %v2127_v7 = vld [vmem:[#allocation6 + $0x18] sm:$0xff]  ;;  %v1706_v8 = vld [vmem:[%s2560_s2] ss:$0 sm:$0xff]  ;;  %s1930_s16 = smov 108   ;;  %s1931_s15 = smov 84   ;;  %vm784_vm4 = vcmask 195584  }
  0x35   : > { %s1932_s21 = smov 92   ;;  %s1933_s22 = smov 76   ;;  %vm779_vm5 = vcmask 130048  }
  0x36   : > { %613 = vmatpush.bf16.msra.mxu0 %v1578_v3  ;;  %1581 = vmatpush.bf16.msra.mxu1 %v1578_v3  ;;  %s1934_s26 = smov 68   ;;  %s1935_s11 = smov 64  }
  0x37   : > { %s1936_s14 = smov 56   ;;  %s1937_s27 = smov 48  }
  0x38   : > { %s1938_s19 = smov 8   ;;  %s1939_s20 = smov 16  }
  0x39   : > { %1532 = vmatmul.msk.bf16.vlgmr.msra.gmra.mxu0 %vm599_vm0, %v1576_v5  ;;  %1533 = vmatmul.msk.bf16.vlgmr.msra.gmra.mxu1 %vm599_vm0, %v1577_v6  ;;  %p518_p1 = scmp.lt.s32.totalorder %s1907_s30, 1  ;;  %s1940_s24 = smov 24  }
  0x3b   : > { %s2590_s30 = smov (!%p518_p1, %s1907_s30), 1 }
  0x3c   : > { %807 = vrot.lane.b32.xlu2 %v2127_v7, %s1925_s1  ;;  %s2275_s3 = sshll.u32 %s2590_s30, 6  ;;  %s1941_s30 = smov 40  }
  0x8e   : > { %v802_v9 = vpop.permute.xlu2 %801 }
  0x96   : > { %v2219_v21 = vpop.permute.xlu2 %807 }
  0xa5   : > { %v2243_v25 = vpop.permute.xlu1 %805  ;;  %v2245_v27 = vpop.permute.xlu0 %803 }
  0xb6   : > { %v615_v10 = vpop.f32.mrf.mxu0  ;;  %v620_v11 = vpop.f32.mrf.mxu1 }
  0xb7   : > { %v2134_v12 = vadd.f32 %v1706_v8, %v615_v10  ;;  %v2136_v13 = vadd.f32 %v1706_v8, %v620_v11 }
  0xb9   : > { %v2139_v14 = vmul.f32 %v802_v9, %v2134_v12  ;;  %653 = vrot.lane.b32.xlu1 %v2136_v13, %s1926_s12  ;;  %661 = vrot.lane.b32.xlu2 %v2134_v12, %s1927_s13  ;;  %v2181_v17 = vpack.c.bf16 %v2136_v13, %v2136_v13  ;;  %v2193_v20 = vpack.c.bf16 %v2134_v12, %v2134_v12 }
  0xba   : > { %649 = vrot.lane.b32.xlu0 %v2134_v12, %s1926_s12 }
  0xbe   : > { %v622_v15 = vpop.f32.mrf.mxu1  ;;  %v617_v18 = vpop.f32.mrf.mxu0 }
  0xbf   : > { %v2171_v16 = vadd.f32 %v1706_v8, %v622_v15  ;;  %v2189_v19 = vadd.f32 %v1706_v8, %v617_v18 }
  0xc1   : > { %682 = vrot.lane.b32.xlu1 %v2136_v13, %s1928_s17  ;;  %678 = vrot.lane.b32.xlu2 %v2134_v12, %s1928_s17  ;;  %v2229_v23 = vpack.c.bf16 %v2189_v19, %v2189_v19  ;;  %v2268_v39 = vpack.c.bf16 %v2171_v16, %v2171_v16 }
  0xc2   : > { %665 = vrot.lane.b32.xlu0 %v2136_v13, %s1927_s13 }
  0xc9   : > { %710 = vrot.lane.b32.xlu1 %v2134_v12, %s1929_s25  ;;  %698 = vrot.lane.b32.xlu2 %v2136_v13, %s1930_s16 }
  0xca   : > { %694 = vrot.lane.b32.xlu0 %v2134_v12, %s1930_s16 }
  0xd1   : > { %833 = vrot.lane.b32.xlu1 %v2134_v12, %s1931_s15  ;;  %821 = vrot.lane.b32.xlu2 %v2136_v13, %s1932_s21 }
  0xd2   : > { %714 = vrot.lane.b32.xlu0 %v2136_v13, %s1929_s25 }
  0xd9   : > { %853 = vrot.lane.b32.xlu1 %v2136_v13, %s1933_s22  ;;  %849 = vrot.lane.b32.xlu2 %v2134_v12, %s1933_s22 }
  0xda   : > { %817 = vrot.lane.b32.xlu0 %v2134_v12, %s1932_s21 }
  0xe1   : > { %655 = vrot.lane.b32.xlu1 %v2171_v16, %s1926_s12  ;;  %869 = vrot.lane.b32.xlu2 %v2136_v13, %s1934_s26 }
  0xe2   : > { %837 = vrot.lane.b32.xlu0 %v2136_v13, %s1931_s15 }
  0xe9   : > { %667 = vrot.lane.b32.xlu1 %v2171_v16, %s1927_s13  ;;  %1010 = vrot.lane.b32.xlu2 %v2181_v17, %s1935_s11 }
  0xea   : > { %865 = vrot.lane.b32.xlu0 %v2134_v12, %s1934_s26 }
  0xf1   : > { %696 = vrot.lane.b32.xlu1 %v2189_v19, %s1930_s16  ;;  %1064 = vrot.lane.b32.xlu2 %v2181_v17, %s1936_s14 }
  0xf2   : > { %1006 = vrot.lane.b32.xlu0 %v2193_v20, %s1935_s11 }
  0xf9   : > { %716 = vrot.lane.b32.xlu1 %v2171_v16, %s1929_s25  ;;  %1115 = vrot.lane.b32.xlu2 %v2181_v17, %s1937_s27 }
  0xfa   : > { %1060 = vrot.lane.b32.xlu0 %v2193_v20, %s1936_s14 }
 0x101   : > { %819 = vrot.lane.b32.xlu1 %v2189_v19, %s1932_s21  ;;  %663 = vrot.lane.b32.xlu2 %v2189_v19, %s1927_s13  ;;  %s2281_s13 = scalar_lea.vmem %s2566_s8, %s2275_s3 }
 0x102   : > { %1111 = vrot.lane.b32.xlu0 %v2193_v20, %s1937_s27 }
 0x109   : > { %839 = vrot.lane.b32.xlu1 %v2171_v16, %s1931_s15  ;;  %684 = vrot.lane.b32.xlu2 %v2171_v16, %s1928_s17 }
 0x10a   : > { %651 = vrot.lane.b32.xlu0 %v2189_v19, %s1926_s12 }
 0x111   : > { %867 = vrot.lane.b32.xlu1 %v2189_v19, %s1934_s26  ;;  %712 = vrot.lane.b32.xlu2 %v2189_v19, %s1929_s25 }
 0x112   : > { %680 = vrot.lane.b32.xlu0 %v2189_v19, %s1928_s17 }
 0x113   : > { %v662_v22 = vpop.permute.xlu2 %661 }
 0x119   : > { %1008 = vrot.lane.b32.xlu1 %v2229_v23, %s1935_s11  ;;  %835 = vrot.lane.b32.xlu2 %v2189_v19, %s1931_s15  ;;  %s1942_s15 = smov 120  }
 0x11a   : > { %700 = vrot.lane.b32.xlu0 %v2171_v16, %s1930_s16  ;;  %s2381_s16 = scalar_lea.vmem %s2564_s6, %s2275_s3 }
 0x11b   : > { %v679_v24 = vpop.permute.xlu2 %678 }
 0x121   : > { %1062 = vrot.lane.b32.xlu1 %v2229_v23, %s1936_s14  ;;  %855 = vrot.lane.b32.xlu2 %v2171_v16, %s1933_s22 }
 0x122   : > { %823 = vrot.lane.b32.xlu0 %v2171_v16, %s1932_s21  ;;  %s1943_s21 = smov 112  }
 0x123   : > { %v699_v26 = vpop.permute.xlu2 %698 }
 0x129   : > { %1113 = vrot.lane.b32.xlu1 %v2229_v23, %s1937_s27 }
 0x12a   : > { %851 = vrot.lane.b32.xlu0 %v2189_v19, %s1933_s22  ;;  %s1944_s22 = smov 104  }
 0x12b   : > { %v654_v28 = vpop.permute.xlu1 %653  ;;  %v822_v29 = vpop.permute.xlu2 %821 }
 0x12c   : > { %v650_v30 = vpop.permute.xlu0 %649 }
 0x12d   : > { %v2252_v31 = vsel %vm673_vm1, %v650_v30, %v662_v22  ;;  %v690_v32 = vsel %vm673_vm1, %v679_v24, %v650_v30 }
 0x12e   : > { %730 = vrot.lane.b32.xlu2 %v690_v32, %s1938_s19 }
 0x132   : > { %871 = vrot.lane.b32.xlu0 %v2171_v16, %s1934_s26  ;;  %s1946_s26 = smov 88  }
 0x133   : > { %v683_v33 = vpop.permute.xlu1 %682  ;;  %v850_v34 = vpop.permute.xlu2 %849 }
 0x134   : > { %v666_v35 = vpop.permute.xlu0 %665  ;;  %v692_v36 = vsel %vm673_vm1, %v683_v33, %v654_v28  ;;  %v708_v37 = vsel %vm673_vm1, %v699_v26, %v683_v33 }
 0x135   : > { %v2261_v38 = vsel %vm673_vm1, %v654_v28, %v666_v35  ;;  %734 = vrot.lane.b32.xlu1 %v692_v36, %s1938_s19 }
 0x136   : > { %750 = vrot.lane.b32.xlu2 %v708_v37, %s1939_s20 }
 0x13a   : > { %1012 = vrot.lane.b32.xlu0 %v2268_v39, %s1935_s11  ;;  %s1947_s11 = smov 80  }
 0x13b   : > { %v711_v40 = vpop.permute.xlu1 %710  ;;  %v870_v41 = vpop.permute.xlu2 %869 }
 0x13c   : > { %v695_v42 = vpop.permute.xlu0 %694 }
 0x13d   : > { %v722_v43 = vsel %vm673_vm1, %v711_v40, %v695_v42  ;;  %v706_v49 = vsel %vm673_vm1, %v695_v42, %v679_v24 }
 0x13e   : > { %762 = vrot.lane.b32.xlu1 %v722_v43, %s1940_s24 }
 0x142   : > { %1066 = vrot.lane.b32.xlu0 %v2268_v39, %s1936_s14  ;;  %s1948_s14 = smov 72  }
 0x143   : > { %v834_v44 = vpop.permute.xlu1 %833  ;;  %v1011_v45 = vpop.permute.xlu2 %1010 }
 0x144   : > { %1020 = vst.msk [vmem:[%s2281_s13 + $0x8] sm:$0xf] %vm969_vm2, %v1011_v45  ;;  %v715_v46 = vpop.permute.xlu0 %714  ;;  %v861_v47 = vsel %vm673_vm1, %v850_v34, %v834_v44 }
 0x145   : > { %v2289_v48 = vsel %vm673_vm1, %v822_v29, %v715_v46  ;;  %901 = vrot.lane.b32.xlu2 %v861_v47, %s1939_s20  ;;  %v724_v56 = vsel %vm673_vm1, %v715_v46, %v699_v26 }
 0x14a   : > { %746 = vrot.lane.b32.xlu0 %v706_v49, %s1939_s20 }
 0x14b   : > { %v854_v50 = vpop.permute.xlu1 %853  ;;  %v1065_v51 = vpop.permute.xlu2 %1064 }
 0x14c   : > { %1544 = vst.msk [vmem:[%s2281_s13 + $0x18] sm:$0xf] %vm969_vm2, %v1065_v51  ;;  %v818_v52 = vpop.permute.xlu0 %817  ;;  %v879_v53 = vsel %vm673_vm1, %v870_v41, %v854_v50 }
 0x14d   : > { %v2298_v54 = vsel %vm673_vm1, %v818_v52, %v711_v40  ;;  %921 = vrot.lane.b32.xlu2 %v879_v53, %s1940_s24  ;;  %v845_v55 = vsel %vm673_vm1, %v834_v44, %v818_v52 }
 0x14e   : > { %885 = vrot.lane.b32.xlu1 %v845_v55, %s1938_s19 }
 0x152   : > { %766 = vrot.lane.b32.xlu0 %v724_v56, %s1940_s24 }
 0x153   : > { %v656_v57 = vpop.permute.xlu1 %655  ;;  %v1116_v58 = vpop.permute.xlu2 %1115 }
 0x154   : > { %1556 = vst.msk [vmem:[%s2281_s13 + $0x28] sm:$0xf] %vm969_vm2, %v1116_v58  ;;  %v838_v59 = vpop.permute.xlu0 %837 }
 0x155   : > { %v863_v60 = vsel %vm673_vm1, %v854_v50, %v838_v59  ;;  %v847_v61 = vsel %vm673_vm1, %v838_v59, %v822_v29 }
 0x156   : > { %905 = vrot.lane.b32.xlu1 %v863_v60, %s1939_s20 }
 0x15a   : > { %889 = vrot.lane.b32.xlu0 %v847_v61, %s1938_s19 }
 0x15b   : > { %v668_v62 = vpop.permute.xlu1 %667  ;;  %v664_v63 = vpop.permute.xlu2 %663 }
 0x15c   : > { %v2312_v0 = vsel %vm673_vm1, %v656_v57, %v668_v62  ;;  %v866_v3 = vpop.permute.xlu0 %865 }
 0x15d   : > { %v877_v5 = vsel %vm673_vm1, %v866_v3, %v850_v34  ;;  %v633_v3 = vld [vmem:[#allocation9] sm:$0xff] }
 0x162   : > { %917 = vrot.lane.b32.xlu0 %v877_v5, %s1940_s24 }
 0x163   : > { %v697_v6 = vpop.permute.xlu1 %696  ;;  %v685_v8 = vpop.permute.xlu2 %684 }
 0x164   : > { %v1007_v9 = vpop.permute.xlu0 %1006  ;;  %v693_v10 = vsel %vm673_vm1, %v685_v8, %v656_v57 }
 0x165   : > { %1018 = vst.msk [vmem:[%s2281_s13] sm:$0xf] %vm969_vm2, %v1007_v9  ;;  %736 = vrot.lane.b32.xlu2 %v693_v10, %s1938_s19 }
 0x16b   : > { %v717_v11 = vpop.permute.xlu1 %716  ;;  %v713_v15 = vpop.permute.xlu2 %712 }
 0x16c   : > { %v1061_v18 = vpop.permute.xlu0 %1060  ;;  %v723_v22 = vsel %vm673_vm1, %v713_v15, %v697_v6 }
 0x16d   : > { %1542 = vst.msk [vmem:[%s2281_s13 + $0x10] sm:$0xf] %vm969_vm2, %v1061_v18  ;;  %764 = vrot.lane.b32.xlu2 %v723_v22, %s1940_s24  ;;  %v631_v18 = vld [vmem:[#allocation7 + $0x10] sm:$0xff] }
 0x16e   : > { %v635_v22 = vld [vmem:[#allocation9 + $0x10] sm:$0xff] }
 0x173   : > { %v820_v24 = vpop.permute.xlu1 %819  ;;  %v836_v26 = vpop.permute.xlu2 %835 }
 0x174   : > { %v2325_v28 = vsel %vm673_vm1, %v820_v24, %v713_v15  ;;  %v1112_v29 = vpop.permute.xlu0 %1111  ;;  %v846_v30 = vsel %vm673_vm1, %v836_v26, %v820_v24  ;;  %v641_v24 = vmul.f32 %v2119_v4, %v2134_v12  ;;  %v643_v12 = vmul.f32 %v2115_v1, %v2136_v13 }
 0x175   : > { %1554 = vst.msk [vmem:[%s2281_s13 + $0x20] sm:$0xf] %vm969_vm2, %v1112_v29  ;;  %887 = vrot.lane.b32.xlu2 %v846_v30, %s1938_s19 }
 0x17b   : > { %v840_v32 = vpop.permute.xlu1 %839  ;;  %v856_v33 = vpop.permute.xlu2 %855 }
 0x17c   : > { %v652_v34 = vpop.permute.xlu0 %651  ;;  %v864_v35 = vsel %vm673_vm1, %v856_v33, %v840_v32 }
 0x17d   : > { %v2333_v36 = vsel %vm673_vm1, %v652_v34, %v664_v63  ;;  %907 = vrot.lane.b32.xlu2 %v864_v35, %s1939_s20  ;;  %v629_v63 = vld [vmem:[#allocation7] sm:$0xff] }
 0x183   : > { %v868_v37 = vpop.permute.xlu1 %867 }
 0x184   : > { %v681_v40 = vpop.permute.xlu0 %680 }
 0x185   : > { %v707_v41 = vsel %vm673_vm1, %v697_v6, %v681_v40  ;;  %v691_v42 = vsel %vm673_vm1, %v681_v40, %v652_v34  ;;  %v637_v6 = vadd.f32 %v633_v3, %v629_v63  ;;  %v632_v3 = vld [vmem:[#allocation7 + $0x18] sm:$0xff] }
 0x186   : > { %748 = vrot.lane.b32.xlu1 %v707_v41, %s1939_s20  ;;  %732 = vrot.lane.b32.xlu0 %v691_v42, %s1938_s19 }
 0x188   : > { %v731_v61 = vpop.permute.xlu2 %730 }
 0x18b   : > { %v1009_v43 = vpop.permute.xlu1 %1008 }
 0x18c   : > { %1019 = vst.msk [vmem:[%s2281_s13 + $0x4] sm:$0xf] %vm969_vm2, %v1009_v43  ;;  %v701_v44 = vpop.permute.xlu0 %700 }
 0x18d   : > { %v725_v45 = vsel %vm673_vm1, %v717_v11, %v701_v44  ;;  %v709_v46 = vsel %vm673_vm1, %v701_v44, %v685_v8  ;;  %v775_v8 = vsel %vm774_vm3, %v2252_v31, %v731_v61  ;;  %v639_v31 = vadd.f32 %v635_v22, %v631_v18 }
 0x18e   : > { %768 = vrot.lane.b32.xlu1 %v725_v45, %s1940_s24  ;;  %752 = vrot.lane.b32.xlu0 %v709_v46, %s1939_s20 }
 0x190   : > { %v751_v9 = vpop.permute.xlu2 %750 }
 0x193   : > { %v1063_v47 = vpop.permute.xlu1 %1062 }
 0x194   : > { %1543 = vst.msk [vmem:[%s2281_s13 + $0x14] sm:$0xf] %vm969_vm2, %v1063_v47  ;;  %v824_v49 = vpop.permute.xlu0 %823 }
 0x195   : > { %v2349_v50 = vsel %vm673_vm1, %v824_v49, %v717_v11  ;;  %v848_v51 = vsel %vm673_vm1, %v840_v32, %v824_v49 }
 0x196   : > { %891 = vrot.lane.b32.xlu1 %v848_v51, %s1938_s19 }
 0x19b   : > { %v1114_v52 = vpop.permute.xlu1 %1113 }
 0x19c   : > { %1555 = vst.msk [vmem:[%s2281_s13 + $0x24] sm:$0xf] %vm969_vm2, %v1114_v52  ;;  %v852_v53 = vpop.permute.xlu0 %851 }
 0x19d   : > { %v878_v55 = vsel %vm673_vm1, %v868_v37, %v852_v53  ;;  %v862_v56 = vsel %vm673_vm1, %v852_v53, %v836_v26 }
 0x19e   : > { %919 = vrot.lane.b32.xlu1 %v878_v55, %s1940_s24  ;;  %903 = vrot.lane.b32.xlu0 %v862_v56, %s1939_s20  ;;  %v634_v55 = vld [vmem:[#allocation9 + $0x8] sm:$0xff]  ;;  %s2497_s20 = scalar_lea.vmem %s2565_s7, %s2275_s3 }
 0x1a4   : > { %v872_v57 = vpop.permute.xlu0 %871 }
 0x1a5   : > { %v880_v58 = vsel %vm673_vm1, %v872_v57, %v856_v33  ;;  %v902_v33 = vpop.permute.xlu2 %901 }
 0x1a6   : > { %923 = vrot.lane.b32.xlu0 %v880_v58, %s1940_s24 }
 0x1a7   : > { %v735_v60 = vpop.permute.xlu1 %734 }
 0x1a8   : > { %v777_v26 = vsel %vm774_vm3, %v2261_v38, %v735_v60 }
 0x1a9   : > { %v782_v34 = vsel %vm779_vm5, %v777_v26, %v751_v9 }
 0x1ac   : > { %v1013_v59 = vpop.permute.xlu0 %1012 }
 0x1ad   : > { %1021 = vst.msk [vmem:[%s2281_s13 + $0xc] sm:$0xf] %vm969_vm2, %v1013_v59  ;;  %v922_v44 = vpop.permute.xlu2 %921 }
 0x1ae   : > { %1117 = vrot.lane.b32.xlu0 %v2268_v39, %s1937_s27 }
 0x1b0   : > { %v763_v5 = vpop.permute.xlu1 %762 }
 0x1b4   : > { %v1067_v62 = vpop.permute.xlu0 %1066 }
 0x1b5   : > { %1545 = vst.msk [vmem:[%s2281_s13 + $0x1c] sm:$0xf] %vm969_vm2, %v1067_v62 }
 0x1b6   : > { %1162 = vrot.lane.b32.xlu0 %v2193_v20, %s1941_s30 }
 0x1bc   : > { %v747_v10 = vpop.permute.xlu0 %746 }
 0x1bd   : > { %v780_v11 = vsel %vm779_vm5, %v775_v8, %v747_v10 }
 0x1be   : > { %v785_v15 = vsel %vm784_vm4, %v780_v11, %v763_v5  ;;  %v636_v5 = vld [vmem:[#allocation9 + $0x18] sm:$0xff] }
 0x1bf   : > { %v789_v20 = vmul.f32 %v785_v15, %v637_v6  ;;  %v640_v9 = vadd.f32 %v636_v5, %v632_v3 }
 0x1c0   : > { %v886_v30 = vpop.permute.xlu1 %885 }
 0x1c1   : > { %v793_v29 = vadd.f32 %v789_v20, %v641_v24  ;;  %v929_v49 = vsel %vm774_vm3, %v2298_v54, %v886_v30  ;;  %v630_v54 = vld [vmem:[#allocation7 + $0x8] sm:$0xff]  ;;  %v644_v24 = vmul.f32 %v2127_v7, %v2171_v16 }
 0x1c2   : > { %v933_v1 = vsel %vm779_vm5, %v929_v49, %v902_v33  ;;  %v638_v58 = vadd.f32 %v634_v55, %v630_v54 }
 0x1c3   : > { %v965_v32 = vpack.c.bf16 %v793_v29, %v793_v29 }
 0x1c4   : > { %v767_v35 = vpop.permute.xlu0 %766 }
 0x1c5   : > { %v787_v4 = vsel %vm784_vm4, %v782_v34, %v767_v35  ;;  %970 = vst.msk [vmem:[%s2381_s16] sm:$0xf] %vm969_vm2, %v965_v32 }
 0x1c6   : > { %v791_v38 = vmul.f32 %v787_v4, %v639_v31 }
 0x1c8   : > { %v795_v37 = vadd.f32 %v791_v38, %v643_v12  ;;  %v906_v42 = vpop.permute.xlu1 %905 }
 0x1ca   : > { %v967_v40 = vpack.c.bf16 %v795_v37, %v795_v37 }
 0x1cc   : > { %972 = vst.msk [vmem:[%s2381_s16 + $0x8] sm:$0xf] %vm969_vm2, %v967_v40  ;;  %v890_v41 = vpop.permute.xlu0 %889 }
 0x1cd   : > { %v931_v43 = vsel %vm774_vm3, %v2289_v48, %v890_v41  ;;  %v737_v48 = vpop.permute.xlu2 %736  ;;  %v815_v41 = vmul.f32 %v2243_v25, %v2136_v13 }
 0x1ce   : > { %v935_v45 = vsel %vm779_vm5, %v931_v43, %v906_v42  ;;  %v778_v10 = vsel %vm774_vm3, %v2312_v0, %v737_v48 }
 0x1cf   : > { %v939_v46 = vsel %vm784_vm4, %v935_v45, %v922_v44 }
 0x1d0   : > { %v943_v47 = vmul.f32 %v939_v46, %v639_v31 }
 0x1d2   : > { %953 = vrot.lane.b32.xlu0 %v943_v47, %s1925_s1 }
 0x1d4   : > { %v918_v51 = vpop.permute.xlu0 %917 }
 0x1d5   : > { %v937_v52 = vsel %vm784_vm4, %v933_v1, %v918_v51  ;;  %v765_v60 = vpop.permute.xlu2 %764 }
 0x1d6   : > { %v941_v53 = vmul.f32 %v937_v52, %v637_v6  ;;  %v642_v6 = vmul.f32 %v2117_v2, %v2189_v19  ;;  %v814_v52 = vmul.f32 %v2245_v27, %v2189_v19  ;;  %v816_v19 = vmul.f32 %v2219_v21, %v2171_v16 }
 0x1d8   : > { %949 = vrot.lane.b32.xlu1 %v941_v53, %s1925_s1 }
 0x1da   : > { %1030 = vrot.lane.b32.xlu0 %v967_v40, %s1942_s15 }
 0x1dd   : > { %v888_v31 = vpop.permute.xlu2 %887 }
 0x1de   : > { %v930_v0 = vsel %vm774_vm3, %v2325_v28, %v888_v31 }
 0x1e0   : > { %1026 = vrot.lane.b32.xlu1 %v965_v32, %s1942_s15 }
 0x1e2   : > { %1081 = vrot.lane.b32.xlu0 %v967_v40, %s1943_s21 }
 0x1e5   : > { %v908_v4 = vpop.permute.xlu2 %907 }
 0x1e8   : > { %1077 = vrot.lane.b32.xlu1 %v965_v32, %s1943_s21 }
 0x1ea   : > { %1132 = vrot.lane.b32.xlu0 %v967_v40, %s1944_s22 }
 0x1f0   : > { %1128 = vrot.lane.b32.xlu1 %v965_v32, %s1944_s22 }
 0x1f8   : > { %v749_v56 = vpop.permute.xlu1 %748  ;;  %v733_v57 = vpop.permute.xlu0 %732 }
 0x1f9   : > { %v776_v59 = vsel %vm774_vm3, %v2333_v36, %v733_v57 }
 0x1fa   : > { %v781_v61 = vsel %vm779_vm5, %v776_v59, %v749_v56 }
 0x1fb   : > { %v786_v62 = vsel %vm784_vm4, %v781_v61, %v765_v60 }
 0x1fc   : > { %v790_v63 = vmul.f32 %v786_v62, %v638_v58 }
 0x1fe   : > { %v794_v8 = vadd.f32 %v790_v63, %v642_v6 }
 0x200   : > { %v769_v11 = vpop.permute.xlu1 %768  ;;  %v753_v36 = vpop.permute.xlu0 %752  ;;  %v966_v15 = vpack.c.bf16 %v794_v8, %v794_v8 }
 0x201   : > { %v783_v18 = vsel %vm779_vm5, %v778_v10, %v753_v36 }
 0x202   : > { %v788_v22 = vsel %vm784_vm4, %v783_v18, %v769_v11  ;;  %971 = vst.msk [vmem:[%s2381_s16 + $0x4] sm:$0xf] %vm969_vm2, %v966_v15 }
 0x203   : > { %v792_v20 = vmul.f32 %v788_v22, %v640_v9 }
 0x205   : > { %v796_v26 = vadd.f32 %v792_v20, %v644_v24 }
 0x207   : > { %v968_v2 = vpack.c.bf16 %v796_v26, %v796_v26 }
 0x208   : > { %v892_v29 = vpop.permute.xlu1 %891 }
 0x209   : > { %973 = vst.msk [vmem:[%s2381_s16 + $0xc] sm:$0xf] %vm969_vm2, %v968_v2  ;;  %v932_v7 = vsel %vm774_vm3, %v2349_v50, %v892_v29 }
 0x20a   : > { %v936_v12 = vsel %vm779_vm5, %v932_v7, %v908_v4 }
 0x210   : > { %v920_v30 = vpop.permute.xlu1 %919  ;;  %v904_v32 = vpop.permute.xlu0 %903 }
 0x211   : > { %v934_v33 = vsel %vm779_vm5, %v930_v0, %v904_v32 }
 0x212   : > { %v938_v34 = vsel %vm784_vm4, %v934_v33, %v920_v30 }
 0x213   : > { %v942_v35 = vmul.f32 %v938_v34, %v638_v58 }
 0x215   : > { %951 = vrot.lane.b32.xlu2 %v942_v35, %s1925_s1 }
 0x218   : > { %v924_v38 = vpop.permute.xlu0 %923 }
 0x219   : > { %v940_v28 = vsel %vm784_vm4, %v936_v12, %v924_v38 }
 0x21a   : > { %v944_v37 = vmul.f32 %v940_v28, %v640_v9 }
 0x21c   : > { %955 = vrot.lane.b32.xlu1 %v944_v37, %s1925_s1  ;;  %s1945_s1 = smov 96  }
 0x21d   : > { %1028 = vrot.lane.b32.xlu2 %v966_v15, %s1942_s15 }
 0x220   : > { %v1118_v40 = vpop.permute.xlu0 %1117 }
 0x221   : > { %1557 = vst.msk [vmem:[%s2281_s13 + $0x2c] sm:$0xf] %vm969_vm2, %v1118_v40 }
 0x224   : > { %1032 = vrot.lane.b32.xlu1 %v968_v2, %s1942_s15 }
 0x225   : > { %1079 = vrot.lane.b32.xlu2 %v966_v15, %s1943_s21 }
 0x228   : > { %v1163_v50 = vpop.permute.xlu0 %1162 }
 0x229   : > { %1566 = vst.msk [vmem:[%s2281_s13 + $0x30] sm:$0xf] %vm969_vm2, %v1163_v50 }
 0x22c   : > { %1083 = vrot.lane.b32.xlu1 %v968_v2, %s1943_s21 }
 0x22d   : > { %1130 = vrot.lane.b32.xlu2 %v966_v15, %s1944_s22 }
 0x234   : > { %1134 = vrot.lane.b32.xlu1 %v968_v2, %s1944_s22 }
 0x244   : > { %v954_v42 = vpop.permute.xlu0 %953 }
 0x245   : > { %v963_v43 = vadd.f32 %v954_v42, %v815_v41 }
 0x247   : > { %v976_v44 = vpack.c.bf16 %v963_v43, %v963_v43 }
 0x249   : > { %986 = vrot.lane.b32.xlu1 %v976_v44, %s1945_s1 }
 0x24a   : > { %v950_v45 = vpop.permute.xlu1 %949 }
 0x24b   : > { %v961_v46 = vadd.f32 %v950_v45, %v2139_v14 }
 0x24c   : > { %v1031_v47 = vpop.permute.xlu0 %1030 }
 0x24d   : > { %v974_v49 = vpack.c.bf16 %v961_v46, %v961_v46  ;;  %1536 = vst.msk [vmem:[%s2381_s16 + $0x18] sm:$0xf] %vm969_vm2, %v1031_v47 }
 0x24f   : > { %982 = vrot.lane.b32.xlu2 %v974_v49, %s1945_s1 }
 0x251   : > { %1047 = vrot.lane.b32.xlu1 %v976_v44, %s1946_s26 }
 0x252   : > { %v1027_v13 = vpop.permute.xlu1 %1026 }
 0x253   : > { %1534 = vst.msk [vmem:[%s2381_s16 + $0x10] sm:$0xf] %vm969_vm2, %v1027_v13 }
 0x254   : > { %v1082_v25 = vpop.permute.xlu0 %1081 }
 0x255   : > { %1548 = vst.msk [vmem:[%s2381_s16 + $0x28] sm:$0xf] %vm969_vm2, %v1082_v25 }
 0x257   : > { %1043 = vrot.lane.b32.xlu2 %v974_v49, %s1946_s26 }
 0x259   : > { %1098 = vrot.lane.b32.xlu1 %v976_v44, %s1947_s11 }
 0x25a   : > { %v1078_v14 = vpop.permute.xlu1 %1077 }
 0x25b   : > { %1546 = vst.msk [vmem:[%s2381_s16 + $0x20] sm:$0xf] %vm969_vm2, %v1078_v14 }
 0x25c   : > { %v1133_v1 = vpop.permute.xlu0 %1132 }
 0x25d   : > { %1560 = vst.msk [vmem:[%s2381_s16 + $0x38] sm:$0xf] %vm969_vm2, %v1133_v1 }
 0x25f   : > { %1094 = vrot.lane.b32.xlu2 %v974_v49, %s1947_s11 }
 0x261   : > { %1149 = vrot.lane.b32.xlu1 %v976_v44, %s1948_s14 }
 0x262   : > { %v1129_v51 = vpop.permute.xlu1 %1128 }
 0x263   : > { %1558 = vst.msk [vmem:[%s2381_s16 + $0x30] sm:$0xf] %vm969_vm2, %v1129_v51 }
 0x267   : > { %1145 = vrot.lane.b32.xlu2 %v974_v49, %s1948_s14 }
 0x269   : > { %1164 = vrot.lane.b32.xlu1 %v2229_v23, %s1941_s30 }
 0x26f   : > { %v952_v53 = vpop.permute.xlu2 %951 }
 0x270   : > { %v962_v48 = vadd.f32 %v952_v53, %v814_v52 }
 0x272   : > { %v975_v54 = vpack.c.bf16 %v962_v48, %v962_v48 }
 0x274   : > { %984 = vrot.lane.b32.xlu0 %v975_v54, %s1945_s1 }
 0x277   : > { %v1029_v55 = vpop.permute.xlu2 %1028 }
 0x278   : > { %1535 = vst.msk [vmem:[%s2381_s16 + $0x14] sm:$0xf] %vm969_vm2, %v1029_v55 }
 0x27c   : > { %1045 = vrot.lane.b32.xlu0 %v975_v54, %s1946_s26 }
 0x27f   : > { %v1080_v56 = vpop.permute.xlu2 %1079 }
 0x280   : > { %1547 = vst.msk [vmem:[%s2381_s16 + $0x24] sm:$0xf] %vm969_vm2, %v1080_v56 }
 0x284   : > { %1096 = vrot.lane.b32.xlu0 %v975_v54, %s1947_s11 }
 0x287   : > { %v1131_v23 = vpop.permute.xlu2 %1130 }
 0x288   : > { %1559 = vst.msk [vmem:[%s2381_s16 + $0x34] sm:$0xf] %vm969_vm2, %v1131_v23 }
 0x28c   : > { %1147 = vrot.lane.b32.xlu0 %v975_v54, %s1948_s14 }
 0x28e   : > { %v956_v27 = vpop.permute.xlu1 %955 }
 0x28f   : > { %v964_v57 = vadd.f32 %v956_v27, %v816_v19 }
 0x291   : > { %v977_v58 = vpack.c.bf16 %v964_v57, %v964_v57 }
 0x293   : > { %988 = vrot.lane.b32.xlu2 %v977_v58, %s1945_s1 }
 0x294   : > { %1168 = vrot.lane.b32.xlu0 %v2268_v39, %s1941_s30 }
 0x296   : > { %v1033_v59 = vpop.permute.xlu1 %1032 }
 0x297   : > { %1537 = vst.msk [vmem:[%s2381_s16 + $0x1c] sm:$0xf] %vm969_vm2, %v1033_v59 }
 0x29b   : > { %1049 = vrot.lane.b32.xlu2 %v977_v58, %s1946_s26 }
 0x29e   : > { %v1084_v60 = vpop.permute.xlu1 %1083 }
 0x29f   : > { %1549 = vst.msk [vmem:[%s2381_s16 + $0x2c] sm:$0xf] %vm969_vm2, %v1084_v60 }
 0x2a3   : > { %1100 = vrot.lane.b32.xlu2 %v977_v58, %s1947_s11 }
 0x2a6   : > { %v1135_v61 = vpop.permute.xlu1 %1134 }
 0x2a7   : > { %1561 = vst.msk [vmem:[%s2381_s16 + $0x3c] sm:$0xf] %vm969_vm2, %v1135_v61 }
 0x2a9   : > { %v983_v16 = vpop.permute.xlu2 %982 }
 0x2aa   : > { %994 = vst.msk [vmem:[%s2497_s20] sm:$0xf] %vm969_vm2, %v983_v16 }
 0x2ab   : > { %1151 = vrot.lane.b32.xlu2 %v977_v58, %s1948_s14 }
 0x2b1   : > { %v1044_v21 = vpop.permute.xlu2 %1043 }
 0x2b2   : > { %1538 = vst.msk [vmem:[%s2497_s20 + $0x10] sm:$0xf] %vm969_vm2, %v1044_v21 }
 0x2b3   : > { %1166 = vrot.lane.b32.xlu2 %v2181_v17, %s1941_s30 }
 0x2b9   : > { %v1095_v39 = vpop.permute.xlu2 %1094 }
 0x2ba   : > { %1550 = vst.msk [vmem:[%s2497_s20 + $0x20] sm:$0xf] %vm969_vm2, %v1095_v39 }
 0x2bb   : > { %v987_v62 = vpop.permute.xlu1 %986 }
 0x2bc   : > { %996 = vst.msk [vmem:[%s2497_s20 + $0x8] sm:$0xf] %vm969_vm2, %v987_v62 }
 0x2c1   : > { %v1146_v63 = vpop.permute.xlu2 %1145 }
 0x2c2   : > { %1562 = vst.msk [vmem:[%s2497_s20 + $0x30] sm:$0xf] %vm969_vm2, %v1146_v63 }
 0x2c3   : > { %v1048_v3 = vpop.permute.xlu1 %1047 }
 0x2c4   : > { %1540 = vst.msk [vmem:[%s2497_s20 + $0x18] sm:$0xf] %vm969_vm2, %v1048_v3 }
 0x2cb   : > { %v1099_v5 = vpop.permute.xlu1 %1098 }
 0x2cc   : > { %1552 = vst.msk [vmem:[%s2497_s20 + $0x28] sm:$0xf] %vm969_vm2, %v1099_v5 }
 0x2d3   : > { %v1150_v17 = vpop.permute.xlu1 %1149 }
 0x2d4   : > { %1564 = vst.msk [vmem:[%s2497_s20 + $0x38] sm:$0xf] %vm969_vm2, %v1150_v17 }
 0x2db   : > { %v1165_v6 = vpop.permute.xlu1 %1164 }
 0x2dc   : > { %1567 = vst.msk [vmem:[%s2281_s13 + $0x34] sm:$0xf] %vm969_vm2, %v1165_v6 }
 0x2e6   : > { %v985_v8 = vpop.permute.xlu0 %984 }
 0x2e7   : > { %995 = vst.msk [vmem:[%s2497_s20 + $0x4] sm:$0xf] %vm969_vm2, %v985_v8 }
 0x2ed   : > { %v989_v9 = vpop.permute.xlu2 %988 }
 0x2ee   : > { %997 = vst.msk [vmem:[%s2497_s20 + $0xc] sm:$0xf] %vm969_vm2, %v989_v9  ;;  %v1046_v10 = vpop.permute.xlu0 %1045 }
 0x2ef   : > { %1539 = vst.msk [vmem:[%s2497_s20 + $0x14] sm:$0xf] %vm969_vm2, %v1046_v10 }
 0x2f5   : > { %v1050_v11 = vpop.permute.xlu2 %1049 }
 0x2f6   : > { %1541 = vst.msk [vmem:[%s2497_s20 + $0x1c] sm:$0xf] %vm969_vm2, %v1050_v11  ;;  %v1097_v36 = vpop.permute.xlu0 %1096 }
 0x2f7   : > { %1551 = vst.msk [vmem:[%s2497_s20 + $0x24] sm:$0xf] %vm969_vm2, %v1097_v36 }
 0x2fd   : > { %v1101_v15 = vpop.permute.xlu2 %1100 }
 0x2fe   : > { %1553 = vst.msk [vmem:[%s2497_s20 + $0x2c] sm:$0xf] %vm969_vm2, %v1101_v15  ;;  %v1148_v18 = vpop.permute.xlu0 %1147 }
 0x2ff   : > { %1563 = vst.msk [vmem:[%s2497_s20 + $0x34] sm:$0xf] %vm969_vm2, %v1148_v18 }
 0x305   : > { %v1152_v22 = vpop.permute.xlu2 %1151 }
 0x306   : > { %1565 = vst.msk [vmem:[%s2497_s20 + $0x3c] sm:$0xf] %vm969_vm2, %v1152_v22  ;;  %v1169_v20 = vpop.permute.xlu0 %1168 }
 0x307   : > { %1569 = vst.msk [vmem:[%s2281_s13 + $0x3c] sm:$0xf] %vm969_vm2, %v1169_v20 }
 0x30d   : > { %v1167_v24 = vpop.permute.xlu2 %1166 }
 0x30e   : > { %1568 = vst.msk [vmem:[%s2281_s13 + $0x38] sm:$0xf] %vm969_vm2, %v1167_v24 }
 0x30f PF: > { %s24_s10 = sadd.s32 1, %s1915_s10   ;;  %s2582_s27 = smov %s1899_s28 }
 0x310   : > { %p21_p2 = scmp.ge.s32.totalorder %s24_s10, 4   ;;  %s2583_s28 = smov %s1903_s29 }
 0x311   : > { %s2584_s29 = smov %s2088_s18  ;;  %s2585_s30 = smov %s1911_s9 }
 0x312   : > { %s2586_s9 = smov %s2588_s23  ;;  %23 = sbr.rel (!%p21_p2) target bundleno = 10 (0xa), region = 140 }
 0x317   :  { %1292 = vsyncpa [#allocation3], 1 }
 0x318   :  { %1294 = vsyncpa [#allocation3 + $0x1], 1 }
 0x319   :  { %1295 = vsyncpa [#allocation5], 1 }
 0x31a   :  { %1296 = vsyncpa [#allocation8], 1 }

</bundles_post_ra>
